<compile_context>
chip_gen: v7x
topology: tpu7x:2x2x1
jax: 0.10.0
libtpu: 0.0.40
codegen_flags: <defaults>
</compile_context>

<pallas_src>
import functools
import math

import jax
import jax.numpy as jnp
from jax import lax
from jax.experimental import pallas as pl
from jax.experimental.pallas import tpu as pltpu

PI = math.pi
TWO_PI = 2.0 * math.pi
EPS = 1e-10


def _round_up(x, m):
    return -(-x // m) * m


def _pick_p_blk(fp):
    """Sublane block for phase bands: minimize padded waste, tie-break to larger block."""
    candidates = (8, 16, 32)  # powers of two (sublane alignment + in-kernel bitmask)
    return min(candidates, key=lambda p: (_round_up(fp, p) - fp, -p))


def _pick_time_chunk(t, p_blk):
    """128-lane-aligned time chunk; keeps the (n_bins, P_BLK, Tc) binning slab ~0.5-0.7 MB."""
    target = 512 if p_blk <= 16 else 256
    return min(target, _round_up(t, 128))


def _mi_kernel(phase_ref, amp_ref, mi_ref, acc_ref, *, n_bins, p_blk, fa, temperature,
               n_segments, n_t):
    """Per grid point (bc, pb, s, t): soft phase binning for P_BLK phase bands on one time
    chunk, accumulated into a VMEM (Fa+1, n_bins*P_BLK) contraction; entropy epilogue and
    per-segment MI accumulation run on the last time chunk of each segment."""
    s = pl.program_id(2)
    t = pl.program_id(3)

    @pl.when((s == 0) & (t == 0))
    def _():
        mi_ref[...] = jnp.zeros_like(mi_ref)

    @pl.when(t == 0)
    def _():
        acc_ref[...] = jnp.zeros_like(acc_ref)

    nbp = n_bins * p_blk
    t_chunk = phase_ref.shape[-1]

    # Bin centers generated in-kernel (affine linspace), shape (n_bins, 1, 1).
    bidx = lax.broadcasted_iota(jnp.int32, (n_bins, 1, 1), 0).astype(jnp.float32)
    centers = (bidx + jnp.float32(0.5)) * jnp.float32(TWO_PI / n_bins) - jnp.float32(PI)

    # Lane-dense layout: time on lanes, P_BLK on sublanes, n_bins on the leading axis so the
    # softmax reduction is a cheap slab-wise accumulation (no XLU cross-lane work).
    ph = phase_ref[...].reshape(p_blk, t_chunk)          # (P, Tc)
    a = amp_ref[...].reshape(fa + 1, t_chunk)            # (Fa+1, Tc), last row = ones/zeros

    d = ph[None, :, :] - centers + jnp.float32(PI)       # (n_bins, P, Tc), d in (-pi, 3pi)
    # Exact trunc-fmod for d in (-pi, 3pi): trunc(d/2pi) == (d >= 2pi). Same subtraction
    # order as the reference ((d - 2pi) - pi). Assumes phase is given in [-pi, pi].
    wrapped = jnp.where(d >= jnp.float32(TWO_PI), d - jnp.float32(TWO_PI), d) - jnp.float32(PI)
    sim = jnp.abs(wrapped) * jnp.float32(-1.0 / temperature)
    # sim <= 0 and bounded below by -pi/temperature, so exp needs no max-subtraction.
    e = jnp.exp(sim)                                      # (n_bins, P, Tc)
    z = jnp.sum(e, axis=0, keepdims=True)                 # (1, P, Tc)
    w = e * pl.reciprocal(z, approx=True)                 # softmax over bins (EUP reciprocal)

    # (n_bins, P, Tc) -> (n_bins*P, Tc): leading-dim merge, layout no-op.
    w_flat = w.reshape(nbp, t_chunk)
    # (Fa+1, Tc) x (n_bins*P, Tc)^T -> (Fa+1, n_bins*P); the ones row yields w_sum.
    acc_ref[...] += lax.dot_general(a, w_flat, (((1,), (1,)), ((), ())),
                                    preferred_element_type=jnp.float32)

    @pl.when(t == n_t - 1)
    def _():
        acc = acc_ref[...]
        amp_sum = acc[:fa, :]                          # (Fa, n_bins*P)
        w_sum = acc[fa:fa + 1, :] + EPS                # (1, n_bins*P)
        dist = amp_sum / w_sum                         # lane index = bin*P + p

        # Tiny selection-matrix matmuls implement the per-(amp-freq, phase-band) bin
        # reductions without any lane-splitting reshape. sel[r, p] = 1 iff (r mod P) == p.
        row = lax.broadcasted_iota(jnp.int32, (nbp, p_blk), 0)
        col = lax.broadcasted_iota(jnp.int32, (nbp, p_blk), 1)
        sel = ((row & (p_blk - 1)) == col).astype(jnp.float32)     # (n_bins*P, P)

        psum = lax.dot_general(dist, sel, (((1,), (0,)), ((), ())),
                               preferred_element_type=jnp.float32) + EPS       # (Fa, P)
        psum_b = lax.dot_general(psum, sel, (((1,), (1,)), ((), ())),
                                 preferred_element_type=jnp.float32)           # (Fa, n_bins*P)
        qn = jnp.maximum(dist / psum_b, EPS)
        plogp = qn * jnp.log(qn)
        entropy = -lax.dot_general(plogp, sel, (((1,), (0,)), ((), ())),
                                   preferred_element_type=jnp.float32)         # (Fa, P)

        log_nb = jnp.float32(math.log(n_bins))
        seg_mi = (log_nb - entropy) / log_nb                                   # (Fa, P)
        mi_ref[...] += seg_mi.reshape(mi_ref.shape)

    @pl.when((s == n_segments - 1) & (t == n_t - 1))
    def _():
        mi_ref[...] = mi_ref[...] / jnp.float32(n_segments)


def modulation_index(phase, amplitude, *, n_bins=18, temperature=0.1,
                     compute_distributions=False):
    """JAX/Pallas equivalent of ModulationIndex.forward (compute_distributions=False path)."""
    if n_bins <= 0:
        raise ValueError(f"n_bins must be positive, got {n_bins}")
    if temperature <= 0:
        raise ValueError(f"temperature must be positive, got {temperature}")
    if compute_distributions:
        # TODO(synk): compute_distributions=True path (per-segment MI + amplitude distributions) not kernelized.
        raise NotImplementedError("compute_distributions=True not implemented in the Pallas path")

    B, C, Fp, S, T = phase.shape
    Ba, Ca, Fa, Sa, Ta = amplitude.shape
    if B != Ba:
        raise ValueError(f"Batch size mismatch: phase={B}, amplitude={Ba}")
    if C != Ca:
        raise ValueError(f"Channel size mismatch: phase={C}, amplitude={Ca}")
    if T != Ta:
        raise ValueError(f"Time dimension mismatch: phase={T}, amplitude={Ta}")
    if S != Sa:
        raise ValueError(f"Segment dimension mismatch: phase={S}, amplitude={Sa}")

    # effective temperature rule from the reference implementation (original, unpadded count)
    n_phases = B * C * Fp * S * T
    eff_temp = 0.01 if n_phases > 10_000_000 else temperature

    # deterministic "buffers" (same as register_buffer init in __init__)
    phase_bins = jnp.linspace(-jnp.float32(PI), jnp.float32(PI), n_bins + 1,
                              dtype=jnp.float32)
    phase_bin_centers = (phase_bins[1:] + phase_bins[:-1]) / 2.0

    BC = B * C
    p_blk = _pick_p_blk(Fp)
    n_pb = pl.cdiv(Fp, p_blk)
    fp_pad = n_pb * p_blk

    t_chunk = _pick_time_chunk(T, p_blk)
    n_t = pl.cdiv(T, t_chunk)
    t_pad = n_t * t_chunk

    # phase: (B,C,Fp,S,T) -> (BC, n_pb, S, P_BLK, T_pad). Padded phase bands / time columns
    # are computed but never contaminate valid outputs (bands are independent; padded time
    # columns carry zero amplitude AND a zeroed ones-row, so they add nothing to amp/w sums).
    phase_r = phase.astype(jnp.float32).reshape(BC, Fp, S, T)
    if fp_pad != Fp or t_pad != T:
        phase_r = jnp.pad(phase_r, ((0, 0), (0, fp_pad - Fp), (0, 0), (0, t_pad - T)))
    phase_r = phase_r.reshape(BC, n_pb, p_blk, S, t_pad).transpose(0, 1, 3, 2, 4)

    # amplitude: (B,C,Fa,S,T) -> (BC, S, Fa+1, T_pad); append the ones row BEFORE zero
    # time-padding so padded columns of the ones row are zero.
    amp_r = jnp.transpose(amplitude.astype(jnp.float32).reshape(BC, Fa, S, T), (0, 2, 1, 3))
    amp_r = jnp.pad(amp_r, ((0, 0), (0, 0), (0, 1), (0, 0)), constant_values=1.0)
    if t_pad != T:
        amp_r = jnp.pad(amp_r, ((0, 0), (0, 0), (0, 0), (0, t_pad - T)))

    kernel = functools.partial(_mi_kernel, n_bins=n_bins, p_blk=p_blk, fa=Fa,
                               temperature=eff_temp, n_segments=S, n_t=n_t)

    nbp = n_bins * p_blk
    # Advisory cost estimate so XLA can overlap the wrapper reshapes/transposes with the kernel.
    flops = int(2 * BC * n_pb * S * (Fa + 1) * nbp * t_pad + 8 * BC * n_pb * S * nbp * t_pad)
    transcendentals = int(BC * n_pb * S * (nbp + p_blk) * t_pad)
    bytes_accessed = int(phase_r.size * 4 + amp_r.size * 4 * n_pb + BC * n_pb * Fa * p_blk * 4)

    # Per-step VMEM: double-buffered input blocks + soft-binning slab + accumulator scratch.
    est_vmem = (2 * p_blk * t_chunk * 4 + 2 * (Fa + 1) * t_chunk * 4
                + 6 * nbp * t_chunk * 4 + (Fa + 1) * nbp * 4 + 2 * Fa * p_blk * 4)
    try:
        vmem_cap = getattr(pltpu.get_tpu_info(), "vmem_capacity_bytes", None) or (64 << 20)
    except Exception:  # pragma: no cover - conservative fallback (v7x per-core size)
        vmem_cap = 64 << 20
    # Never request the full physical VMEM (v7x has only 64 MiB/core); keep ~25% headroom.
    vmem_limit = int(min(max(32 << 20, 2 * est_vmem), int(0.75 * vmem_cap)))

    # TODO(synk): if BC == 1 and n_pb == 1, both v7x TensorCores cannot share the grid's
    # "parallel" axes; splitting Fa into two output blocks would occupy the second core.
    mi = pl.pallas_call(
        kernel,
        out_shape=jax.ShapeDtypeStruct((BC, n_pb, Fa, p_blk), jnp.float32),
        grid_spec=pltpu.PrefetchScalarGridSpec(
            num_scalar_prefetch=0,
            grid=(BC, n_pb, S, n_t),
            in_specs=[
                pl.BlockSpec((1, 1, 1, p_blk, t_chunk),
                             lambda bc, pb, s, t: (bc, pb, s, 0, t)),
                pl.BlockSpec((1, 1, Fa + 1, t_chunk),
                             lambda bc, pb, s, t: (bc, s, 0, t)),
            ],
            out_specs=pl.BlockSpec((1, 1, Fa, p_blk), lambda bc, pb, s, t: (bc, pb, 0, 0)),
            scratch_shapes=[pltpu.VMEM((Fa + 1, nbp), jnp.float32)],
        ),
        compiler_params=pltpu.CompilerParams(
            dimension_semantics=("parallel", "parallel", "arbitrary", "arbitrary"),
            vmem_limit_bytes=vmem_limit),
        cost_estimate=pl.CostEstimate(flops=flops, transcendentals=transcendentals,
                                      bytes_accessed=bytes_accessed),
    )(phase_r, amp_r)

    # (BC, n_pb, Fa, P_BLK) -> (B, C, Fp, Fa), dropping the padded phase bands.
    mi = jnp.transpose(mi, (0, 1, 3, 2)).reshape(BC, fp_pad, Fa)
    mi = mi[:, :Fp, :].reshape(B, C, Fp, Fa)
    return {
        "mi": mi,            # f32 (torch promotes to f64 via the log(n_bins) buffer; bit-level diffs only)
        "mi_per_segment": None,
        "amplitude_distributions": None,
        "phase_bin_centers": phase_bin_centers,
        "phase_bin_edges": phase_bins,
    }


def _reference_mi(phase, amplitude, *, n_bins=18, temperature=0.1):
    """Pure-JAX reference mirroring the PyTorch semantics (for correctness check)."""
    edges = jnp.linspace(-jnp.pi, jnp.pi, n_bins + 1, dtype=jnp.float32)
    centers = (edges[1:] + edges[:-1]) / 2.0
    d = phase[..., None] - centers + jnp.pi                     # (B,C,Fp,S,T,nb)
    q = d / (2 * jnp.pi)
    qt = jnp.where(q >= 0, jnp.floor(q), jnp.ceil(q))           # trunc-toward-zero fmod
    wrapped = d - qt * 2 * jnp.pi - jnp.pi
    sim = -jnp.abs(wrapped) / temperature
    w = jax.nn.softmax(sim, axis=-1)                            # (B,C,Fp,S,T,nb)
    amp_sum = jnp.einsum("bcpstk,bcast->bcpask", w, amplitude)  # (B,C,Fp,Fa,S,nb)
    w_sum = w.sum(axis=4) + EPS                                 # (B,C,Fp,S,nb)
    dist = amp_sum / w_sum[:, :, :, None]
    dist = dist / (dist.sum(axis=-1, keepdims=True) + EPS)
    dist = jnp.maximum(dist, EPS)
    entropy = -jnp.sum(dist * jnp.log(dist), axis=-1)           # (B,C,Fp,Fa,S)
    log_nb = jnp.float32(math.log(n_bins))
    mi_per_seg = (log_nb - entropy) / log_nb
    return mi_per_seg.mean(axis=-1)                             # (B,C,Fp,Fa)


if __name__ == "__main__":
    def _run_case(key, B, C, Fp, Fa, S, T):
        k_ph, k_amp = jax.random.split(key)
        phase = jax.random.uniform(k_ph, (B, C, Fp, S, T), jnp.float32,
                                   minval=-jnp.pi, maxval=jnp.pi)
        amplitude = jnp.abs(jax.random.normal(k_amp, (B, C, Fa, S, T), jnp.float32)) + 0.1

        out = modulation_index(phase, amplitude, n_bins=18, temperature=0.1)
        mi = jax.block_until_ready(out["mi"])
        ref = jax.block_until_ready(_reference_mi(phase, amplitude, n_bins=18, temperature=0.1))
        assert mi.shape == (B, C, Fp, Fa)
        assert jnp.allclose(mi, ref, rtol=1e-3, atol=2e-5), (
            f"max abs diff: {jnp.max(jnp.abs(mi - ref))}")

    base_key = jax.random.PRNGKey(0)
    k1, k2, k3 = jax.random.split(base_key, 3)
    # small case: Fp padded 3 -> 8, time padded 64 -> 128, single time chunk
    _run_case(k1, 2, 2, 3, 4, 2, 64)
    # Fp=17 now pads to 24 (p_blk=8), time chunked at the grid level (2 x 512)
    _run_case(k2, 1, 2, 17, 5, 3, 1024)
    # p_blk=32 path with t_chunk=256 and a non-multiple-of-128 time axis (300 -> 512)
    _run_case(k3, 1, 1, 32, 5, 2, 300)

    print("KERNEL_OK")
</pallas_src>

<mosaic_0001>
module attributes {stable_mosaic.version = 11 : i64} {
  func.func @_mi_kernel(%arg0: i32, %arg1: i32, %arg2: i32, %arg3: i32, %arg4: memref<1x1x1x8x128xf32, #tpu.memory_space<vmem>>, %arg5: memref<1x1x5x128xf32, #tpu.memory_space<vmem>>, %arg6: memref<1x1x4x8xf32, #tpu.memory_space<vmem>>, %arg7: memref<5x144xf32, #tpu.memory_space<vmem>>) attributes {dimension_semantics = [#tpu.dimension_semantics<parallel>, #tpu.dimension_semantics<parallel>, #tpu.dimension_semantics<arbitrary>, #tpu.dimension_semantics<arbitrary>], iteration_bounds = array<i64: 4, 1, 2, 1>, scalar_prefetch = 0 : i64, scratch_operands = 1 : i64, tpu.core_type = #tpu.core_type<tc>, window_params = [{transform_indices = @transform_0, window_bounds = array<i64: 1, 1, 1, 8, 128>}, {transform_indices = @transform_1, window_bounds = array<i64: 1, 1, 5, 128>}, {transform_indices = @transform_2, window_bounds = array<i64: 1, 1, 4, 8>}]} {
    %c0_i32 = arith.constant 0 : i32
    %0 = arith.cmpi eq, %arg2, %c0_i32 : i32
    %c0_i32_0 = arith.constant 0 : i32
    %1 = arith.cmpi eq, %arg3, %c0_i32_0 : i32
    %2 = arith.andi %0, %1 : i1
    %3 = arith.extui %2 : i1 to i32
    %c0_i32_1 = arith.constant 0 : i32
    %4 = arith.cmpi ne, %3, %c0_i32_1 : i32
    scf.if %4 {
      %cst_29 = arith.constant 0.000000e+00 : f32
      %55 = vector.broadcast %cst_29 : f32 to vector<1x1x4x8xf32>
      %c0_30 = arith.constant 0 : index
      %c0_31 = arith.constant 0 : index
      %c0_32 = arith.constant 0 : index
      %c0_33 = arith.constant 0 : index
      %56 = vector.load %arg6[%c0_30, %c0_31, %c0_32, %c0_33] : memref<1x1x4x8xf32, #tpu.memory_space<vmem>>, vector<1x1x4x8xf32>
      tpu.vector_store %arg6[%c0_30, %c0_31, %c0_32, %c0_33], %55 {strides = array<i32>} : memref<1x1x4x8xf32, #tpu.memory_space<vmem>>, vector<1x1x4x8xf32>,
    } else {
    }
    %c0_i32_2 = arith.constant 0 : i32
    %5 = arith.cmpi eq, %arg3, %c0_i32_2 : i32
    %6 = arith.extui %5 : i1 to i32
    %c0_i32_3 = arith.constant 0 : i32
    %7 = arith.cmpi ne, %6, %c0_i32_3 : i32
    scf.if %7 {
      %cst_29 = arith.constant 0.000000e+00 : f32
      %55 = vector.broadcast %cst_29 : f32 to vector<5x144xf32>
      %c0_30 = arith.constant 0 : index
      %c0_31 = arith.constant 0 : index
      %56 = vector.load %arg7[%c0_30, %c0_31] : memref<5x144xf32, #tpu.memory_space<vmem>>, vector<5x144xf32>
      tpu.vector_store %arg7[%c0_30, %c0_31], %55 {strides = array<i32>} : memref<5x144xf32, #tpu.memory_space<vmem>>, vector<5x144xf32>,
    } else {
    }
    %8 = tpu.iota {dimensions = array<i32: 0>} : vector<18x1x1xi32>
    %9 = arith.sitofp %8 : vector<18x1x1xi32> to vector<18x1x1xf32>
    %cst = arith.constant 5.000000e-01 : f32
    %10 = vector.broadcast %cst : f32 to vector<18x1x1xf32>
    %11 = arith.addf %9, %10 : vector<18x1x1xf32>
    %cst_4 = arith.constant 0.34906584 : f32
    %12 = vector.broadcast %cst_4 : f32 to vector<18x1x1xf32>
    %13 = arith.mulf %11, %12 : vector<18x1x1xf32>
    %cst_5 = arith.constant 3.14159274 : f32
    %14 = vector.broadcast %cst_5 : f32 to vector<18x1x1xf32>
    %15 = arith.subf %13, %14 : vector<18x1x1xf32>
    %c0 = arith.constant 0 : index
    %c0_6 = arith.constant 0 : index
    %c0_7 = arith.constant 0 : index
    %c0_8 = arith.constant 0 : index
    %c0_9 = arith.constant 0 : index
    %16 = vector.load %arg4[%c0, %c0_6, %c0_7, %c0_8, %c0_9] : memref<1x1x1x8x128xf32, #tpu.memory_space<vmem>>, vector<1x1x1x8x128xf32>
    %17 = vector.shape_cast %16 : vector<1x1x1x8x128xf32> to vector<8x128xf32>
    %c0_10 = arith.constant 0 : index
    %c0_11 = arith.constant 0 : index
    %c0_12 = arith.constant 0 : index
    %c0_13 = arith.constant 0 : index
    %18 = vector.load %arg5[%c0_10, %c0_11, %c0_12, %c0_13] : memref<1x1x5x128xf32, #tpu.memory_space<vmem>>, vector<1x1x5x128xf32>
    %19 = vector.shape_cast %18 : vector<1x1x5x128xf32> to vector<5x128xf32>
    %20 = vector.shape_cast %17 : vector<8x128xf32> to vector<1x8x128xf32>
    %21 = vector.broadcast %20 : vector<1x8x128xf32> to vector<18x8x128xf32>
    %22 = vector.broadcast %15 : vector<18x1x1xf32> to vector<18x8x128xf32>
    %23 = arith.subf %21, %22 : vector<18x8x128xf32>
    %cst_14 = arith.constant 3.14159274 : f32
    %24 = vector.broadcast %cst_14 : f32 to vector<18x8x128xf32>
    %25 = arith.addf %23, %24 : vector<18x8x128xf32>
    %cst_15 = arith.constant 6.28318548 : f32
    %26 = vector.broadcast %cst_15 : f32 to vector<18x8x128xf32>
    %27 = arith.cmpf oge, %25, %26 : vector<18x8x128xf32>
    %cst_16 = arith.constant 6.28318548 : f32
    %28 = vector.broadcast %cst_16 : f32 to vector<18x8x128xf32>
    %29 = arith.subf %25, %28 : vector<18x8x128xf32>
    %30 = arith.select %27, %29, %25 : vector<18x8x128xi1>, vector<18x8x128xf32>
    %cst_17 = arith.constant 3.14159274 : f32
    %31 = vector.broadcast %cst_17 : f32 to vector<18x8x128xf32>
    %32 = arith.subf %30, %31 : vector<18x8x128xf32>
    %33 = math.absf %32 : vector<18x8x128xf32>
    %cst_18 = arith.constant -1.000000e+01 : f32
    %34 = vector.broadcast %cst_18 : f32 to vector<18x8x128xf32>
    %35 = arith.mulf %33, %34 : vector<18x8x128xf32>
    %36 = math.exp %35 : vector<18x8x128xf32>
    %cst_19 = arith.constant dense<0.000000e+00> : vector<8x128xf32>
    %37 = vector.multi_reduction <add>, %36, %cst_19 [0] : vector<18x8x128xf32> to vector<8x128xf32>
    %38 = vector.shape_cast %37 : vector<8x128xf32> to vector<1x8x128xf32>
    %39 = tpu.reciprocal %38 {approx = true} : vector<1x8x128xf32> -> vector<1x8x128xf32>
    %40 = vector.broadcast %39 : vector<1x8x128xf32> to vector<18x8x128xf32>
    %41 = arith.mulf %36, %40 : vector<18x8x128xf32>
    %42 = vector.shape_cast %41 : vector<18x8x128xf32> to vector<144x128xf32>
    %c0_20 = arith.constant 0 : index
    %c0_21 = arith.constant 0 : index
    %43 = vector.load %arg7[%c0_20, %c0_21] : memref<5x144xf32, #tpu.memory_space<vmem>>, vector<5x144xf32>
    %cst_22 = arith.constant dense<0.000000e+00> : vector<5x144xf32>
    %44 = tpu.matmul %19, %42, %cst_22 {dimension_numbers = #tpu.dot_dimension_numbers<[1], [1], [0], [0], [0, 0, 1, 0], [], []>} : vector<5x128xf32>, vector<144x128xf32>, vector<5x144xf32> -> vector<5x144xf32>
    %45 = arith.addf %43, %44 : vector<5x144xf32>
    %c0_23 = arith.constant 0 : index
    %c0_24 = arith.constant 0 : index
    %46 = vector.load %arg7[%c0_23, %c0_24] : memref<5x144xf32, #tpu.memory_space<vmem>>, vector<5x144xf32>
    tpu.vector_store %arg7[%c0_23, %c0_24], %45 {strides = array<i32>} : memref<5x144xf32, #tpu.memory_space<vmem>>, vector<5x144xf32>,
    %c0_i32_25 = arith.constant 0 : i32
    %47 = arith.cmpi eq, %arg3, %c0_i32_25 : i32
    %48 = arith.extui %47 : i1 to i32
    %c0_i32_26 = arith.constant 0 : i32
    %49 = arith.cmpi ne, %48, %c0_i32_26 : i32
    scf.if %49 {
      %c0_29 = arith.constant 0 : index
      %c0_30 = arith.constant 0 : index
      %55 = vector.load %arg7[%c0_29, %c0_30] : memref<5x144xf32, #tpu.memory_space<vmem>>, vector<5x144xf32>
      %56 = vector.extract_strided_slice %55 {offsets = [0, 0], sizes = [4, 144], strides = [1, 1]} : vector<5x144xf32> to vector<4x144xf32>
      %57 = vector.extract_strided_slice %55 {offsets = [4, 0], sizes = [1, 144], strides = [1, 1]} : vector<5x144xf32> to vector<1x144xf32>
      %cst_31 = arith.constant 1.000000e-10 : f32
      %58 = vector.broadcast %cst_31 : f32 to vector<1x144xf32>
      %59 = arith.addf %57, %58 : vector<1x144xf32>
      %60 = vector.broadcast %59 : vector<1x144xf32> to vector<4x144xf32>
      %61 = arith.divf %56, %60 : vector<4x144xf32>
      %62 = tpu.iota {dimensions = array<i32: 0>} : vector<144x8xi32>
      %63 = tpu.iota {dimensions = array<i32: 1>} : vector<144x8xi32>
      %c7_i32 = arith.constant 7 : i32
      %64 = vector.broadcast %c7_i32 : i32 to vector<144x8xi32>
      %65 = arith.andi %62, %64 : vector<144x8xi32>
      %66 = arith.cmpi eq, %65, %63 : vector<144x8xi32>
      %67 = arith.extui %66 : vector<144x8xi1> to vector<144x8xi32>
      %68 = arith.sitofp %67 : vector<144x8xi32> to vector<144x8xf32>
      %cst_32 = arith.constant dense<0.000000e+00> : vector<4x8xf32>
      %69 = tpu.matmul %61, %68, %cst_32 {dimension_numbers = #tpu.dot_dimension_numbers<[1], [0], [0], [1], [0, 0, 1, 1], [], []>} : vector<4x144xf32>, vector<144x8xf32>, vector<4x8xf32> -> vector<4x8xf32>
      %cst_33 = arith.constant 1.000000e-10 : f32
      %70 = vector.broadcast %cst_33 : f32 to vector<4x8xf32>
      %71 = arith.addf %69, %70 : vector<4x8xf32>
      %cst_34 = arith.constant dense<0.000000e+00> : vector<4x144xf32>
      %72 = tpu.matmul %71, %68, %cst_34 {dimension_numbers = #tpu.dot_dimension_numbers<[1], [1], [0], [0], [0, 0, 1, 0], [], []>} : vector<4x8xf32>, vector<144x8xf32>, vector<4x144xf32> -> vector<4x144xf32>
      %73 = arith.divf %61, %72 : vector<4x144xf32>
      %cst_35 = arith.constant 1.000000e-10 : f32
      %74 = vector.broadcast %cst_35 : f32 to vector<4x144xf32>
      %75 = arith.maximumf %73, %74 : vector<4x144xf32>
      %76 = math.log %75 : vector<4x144xf32>
      %77 = arith.mulf %75, %76 : vector<4x144xf32>
      %cst_36 = arith.constant dense<0.000000e+00> : vector<4x8xf32>
      %78 = tpu.matmul %77, %68, %cst_36 {dimension_numbers = #tpu.dot_dimension_numbers<[1], [0], [0], [1], [0, 0, 1, 1], [], []>} : vector<4x144xf32>, vector<144x8xf32>, vector<4x8xf32> -> vector<4x8xf32>
      %cst_37 = arith.constant 0.000000e+00 : f32
      %79 = vector.broadcast %cst_37 : f32 to vector<4x8xf32>
      %80 = arith.subf %79, %78 : vector<4x8xf32>
      %cst_38 = arith.constant 2.8903718 : f32
      %81 = vector.broadcast %cst_38 : f32 to vector<4x8xf32>
      %82 = arith.subf %81, %80 : vector<4x8xf32>
      %cst_39 = arith.constant 2.8903718 : f32
      %83 = vector.broadcast %cst_39 : f32 to vector<4x8xf32>
      %84 = arith.divf %82, %83 : vector<4x8xf32>
      %c0_40 = arith.constant 0 : index
      %c0_41 = arith.constant 0 : index
      %c0_42 = arith.constant 0 : index
      %c0_43 = arith.constant 0 : index
      %85 = vector.load %arg6[%c0_40, %c0_41, %c0_42, %c0_43] : memref<1x1x4x8xf32, #tpu.memory_space<vmem>>, vector<1x1x4x8xf32>
      %86 = vector.shape_cast %84 : vector<4x8xf32> to vector<1x1x4x8xf32>
      %87 = arith.addf %85, %86 : vector<1x1x4x8xf32>
      %c0_44 = arith.constant 0 : index
      %c0_45 = arith.constant 0 : index
      %c0_46 = arith.constant 0 : index
      %c0_47 = arith.constant 0 : index
      %88 = vector.load %arg6[%c0_44, %c0_45, %c0_46, %c0_47] : memref<1x1x4x8xf32, #tpu.memory_space<vmem>>, vector<1x1x4x8xf32>
      tpu.vector_store %arg6[%c0_44, %c0_45, %c0_46, %c0_47], %87 {strides = array<i32>} : memref<1x1x4x8xf32, #tpu.memory_space<vmem>>, vector<1x1x4x8xf32>,
    } else {
    }
    %c1_i32 = arith.constant 1 : i32
    %50 = arith.cmpi eq, %arg2, %c1_i32 : i32
    %c0_i32_27 = arith.constant 0 : i32
    %51 = arith.cmpi eq, %arg3, %c0_i32_27 : i32
    %52 = arith.andi %50, %51 : i1
    %53 = arith.extui %52 : i1 to i32
    %c0_i32_28 = arith.constant 0 : i32
    %54 = arith.cmpi ne, %53, %c0_i32_28 : i32
    scf.if %54 {
      %c0_29 = arith.constant 0 : index
      %c0_30 = arith.constant 0 : index
      %c0_31 = arith.constant 0 : index
      %c0_32 = arith.constant 0 : index
      %55 = vector.load %arg6[%c0_29, %c0_30, %c0_31, %c0_32] : memref<1x1x4x8xf32, #tpu.memory_space<vmem>>, vector<1x1x4x8xf32>
      %cst_33 = arith.constant 2.000000e+00 : f32
      %56 = vector.broadcast %cst_33 : f32 to vector<1x1x4x8xf32>
      %57 = arith.divf %55, %56 : vector<1x1x4x8xf32>
      %c0_34 = arith.constant 0 : index
      %c0_35 = arith.constant 0 : index
      %c0_36 = arith.constant 0 : index
      %c0_37 = arith.constant 0 : index
      %58 = vector.load %arg6[%c0_34, %c0_35, %c0_36, %c0_37] : memref<1x1x4x8xf32, #tpu.memory_space<vmem>>, vector<1x1x4x8xf32>
      tpu.vector_store %arg6[%c0_34, %c0_35, %c0_36, %c0_37], %57 {strides = array<i32>} : memref<1x1x4x8xf32, #tpu.memory_space<vmem>>, vector<1x1x4x8xf32>,
    } else {
    }
    return
  }
  func.func @transform_0(%arg0: i32, %arg1: i32, %arg2: i32, %arg3: i32) -> (i32, i32, i32, i32, i32) {
    %c0_i32 = arith.constant 0 : i32
    %c0_i32_0 = arith.constant 0 : i32
    return %arg0, %arg1, %arg2, %c0_i32, %arg3 : i32, i32, i32, i32, i32
  }
  func.func @transform_1(%arg0: i32, %arg1: i32, %arg2: i32, %arg3: i32) -> (i32, i32, i32, i32) {
    %c0_i32 = arith.constant 0 : i32
    %c0_i32_0 = arith.constant 0 : i32
    return %arg0, %arg2, %c0_i32, %arg3 : i32, i32, i32, i32
  }
  func.func @transform_2(%arg0: i32, %arg1: i32, %arg2: i32, %arg3: i32) -> (i32, i32, i32, i32) {
    %c0_i32 = arith.constant 0 : i32
    %c0_i32_0 = arith.constant 0 : i32
    %c0_i32_1 = arith.constant 0 : i32
    return %arg0, %arg1, %c0_i32, %c0_i32_0 : i32, i32, i32, i32
  }
}

</mosaic_0001>

<bundles_post_ra>
// kernel: tpu_custom_call.1
= control target key start
LH: loop header
LB: loop body
LE: loop exit
PB: predicated region body
PF: predicated region fallthrough
CT: control target
= control target key end

     0   :  { %7 = vsyncpa [#allocation4], 0  ;;  %s2300_s0 = inlined_call_operand.vmem [shape: f32[4,1,2,8,128], index: 0, kind: input, shape index: {}]   ;;  %s2301_s1 = inlined_call_operand.vmem [shape: f32[4,2,5,128], index: 1, kind: input, shape index: {}]   ;;  %s2302_s2 = inlined_call_operand.hbm [shape: f32[4,1,4,8], index: 2, kind: output, shape index: {}]  }
   0x1   :  { %9 = vsyncpa [#allocation4 + $0x1], 0  ;;  %s1681_s9 = smov 0   ;;  %s1683_s10 = smov 0  }
   0x2   :  { %s1685_s11 = smov 0   ;;  %s1687_s12 = smov 0  }
   0x3   :  { %s1689_s13 = smov 0   ;;  %s1691_s14 = smov 0  }
   0x4   :  { %s1693_s15 = smov 0   ;;  %s1695_s16 = smov 0  }
   0x5 LB: > { %s1176_s17 = sadd.s32 4294967295, %s1659_s16   ;;  %s1177_s18 = sadd.s32 4294967294, %s1659_s16   ;;  %s1659_s16 = sphi %s1695_s16, %s15_s16   ;;  %s1655_s15 = sphi %s1693_s15, %s2341_s15   ;;  %s1651_s14 = sphi %s1691_s14, %s2340_s14   ;;  %s1647_s13 = sphi %s1689_s13, %s2339_s13   ;;  %s1643_s12 = sphi %s1687_s12, %s2338_s12   ;;  %s1639_s11 = sphi %s1685_s11, %s2337_s11   ;;  %s1635_s10 = sphi %s1683_s10, %s2336_s10   ;;  %s1631_s9 = sphi %s1681_s9, %s2335_s9  }
   0x6   : > { %s33_s19 = sadd.s32 1, %s1651_s14  ;;  %s41_s20 = sadd.s32 1, %s1655_s15 }
   0x7   : > { %p35_p0 = scmp.ge.s32.totalorder %s33_s19, 2  ;;  %p122_p1 = scmp.ne.s32.totalorder %s1639_s11, %s1635_s10 }
   0x8   : > { %p123_p2 = scmp.eq.s32.totalorder %s1176_s17, 7  ;;  %p128_p4 = scmp.ne.s32.totalorder %s1635_s10, %s1631_s9 }
   0x9   : > { %s2343_s19 = smov (%p35_p0, %s33_s19), 0  ;;  %s2345_s20 = smov (!%p35_p0, %s41_s20), %s1655_s15 }
   0xa   : > { %p1730_p3 = por %p123_p2, %p122_p1  ;;  %p43_p5 = scmp.ge.s32.totalorder %s2345_s20, 4 }
   0xb   : > { %p129_p6 = scmp.eq.s32.totalorder %s1177_s18, 7  ;;  %p1180_p7 = scmp.ge.s32.totalorder %s1659_s16, 1 }
   0xc   : > { %p179_p8 = scmp.lt.s32.totalorder %s1659_s16, 9  ;;  %s2347_s20 = smov (%p43_p5, %s2345_s20), 0 }
   0xd   : > { %p1740_p9 = por %p129_p6, %p128_p4  ;;  %s107_s23 = ssub.s32 %s1655_s15, %s2347_s20 }
   0xe   : > { %p180_p10 = pnand %p1180_p7, %p179_p8  ;;  %s112_s24 = sadd.s32 1, %s1639_s11 }
   0xf   : > { %p110_p11 = scmp.eq.s32.totalorder %s107_s23, 0  ;;  %s219_s26 = sand.u32 (!%p180_p10), 1, %s1635_s10  }
  0x10   : > { %183 = sbr.rel (%p180_p10) target bundleno = 1153 (0x481), region = 28  ;;  %p222_p12 = scmp.lt.s32.totalorder (!%p180_p10), %s1647_s13, 3 }
  0x11   : > { %s1748_s25 = scalar_select %p110_p11, %s1639_s11, %s112_s24  }
  0x12   : > { %s1181_s27 = sshll.u32 (!%p180_p10), %s219_s26, 2  ;;  %p226_p13 = scmp.lt.s32.totalorder (!%p180_p10), %s1643_s12, 1 }
  0x13   : > { %p248_p0 = scmp.eq.s32.totalorder (!%p180_p10), %s1643_s12, 0  ;;  %s1766_s23 = scalar_lea.vmem (!%p180_p10), [#allocation3], %s1181_s27 }
  0x17   : > { %s223_s28 = scalar_select %p222_p12, %s1647_s13, 3 }
  0x18   : > { %s227_s29 = scalar_select %p226_p13, %s1643_s12, 1 }
  0x19   : > { %s1182_s30 = sshll.u32 %s223_s28, 1  ;;  %253 = sbr.rel (!%p248_p0) target bundleno = 32 (0x20), region = 32  ;;  %vm254_vm0 = vcmask (%p248_p0), 60416   ;;  %v1661_v0 = vmov (%p248_p0), 0.0  }
  0x1a   : > { %s234_s3 = sadd.s32 %s1182_s30, %s227_s29  ;;  %255 = vst.msk [vmem:[%s1766_s23] sm:$0xf] (%p248_p0), %vm254_vm0, %v1661_v0 }
  0x1b   : > { %s1183_s4 = sshll.u32 %s234_s3, 3 }
  0x1c   : > { %s236_s7 = scalar_lea.vmem %s2300_s0, %s1183_s4  ;;  %s1764_s18 = scalar_lea.vmem %s2301_s1, %s1183_s4 }
  0x20 PF: > { %v1662_v1 = vmov 0.0|0.0   ;;  %v334_v2 = vld [vmem:[%s236_s7] sm:$0xff]  ;;  %p1038_p1 = scmp.eq.s32.totalorder %s1643_s12, 1 }
  0x21   : > { %1323 = vmatprep.subr.bf16.mxu0 %v1662_v1  ;;  %1350 = vmatprep.subr.bf16.mxu1 %v1662_v1  ;;  %v1187_v3 = vadd.f32 2.9670599, %v334_v2  ;;  %v1188_v4 = vadd.f32 2.6179938, %v334_v2  ;;  %v1189_v5 = vadd.f32 2.268928, %v334_v2 }
  0x22   : > { %v1190_v6 = vadd.f32 1.9198623, %v334_v2  ;;  %v1191_v7 = vadd.f32 1.5707965, %v334_v2  ;;  %v1192_v8 = vadd.f32 1.2217306, %v334_v2 }
  0x23   : > { %v1193_v9 = vadd.f32 0.8726647, %v334_v2  ;;  %v1194_v10 = vadd.f32 0.5235989, %v334_v2  ;;  %v1195_v11 = vadd.f32 0.17453313, %v334_v2 }
  0x24   : > { %v1196_v12 = vadd.f32 -0.17453265, %v334_v2  ;;  %v1197_v13 = vadd.f32 -0.5235987, %v334_v2  ;;  %v1198_v14 = vadd.f32 -0.8726642, %v334_v2 }
  0x25   : > { %v1199_v15 = vadd.f32 -1.2217305, %v334_v2  ;;  %v1200_v16 = vadd.f32 -1.5707963, %v334_v2  ;;  %v1201_v17 = vadd.f32 -1.919862, %v334_v2 }
  0x26   : > { %v1202_v18 = vadd.f32 -2.2689278, %v334_v2  ;;  %v1203_v19 = vadd.f32 -2.6179936, %v334_v2  ;;  %v1204_v20 = vadd.f32 -2.9670594, %v334_v2 }
  0x27   : > { %v354_v21 = vadd.f32 3.1415927, %v1187_v3  ;;  %v355_v22 = vadd.f32 3.1415927, %v1188_v4  ;;  %v356_v23 = vadd.f32 3.1415927, %v1189_v5 }
  0x28   : > { %v357_v24 = vadd.f32 3.1415927, %v1190_v6  ;;  %v358_v25 = vadd.f32 3.1415927, %v1191_v7  ;;  %v359_v26 = vadd.f32 3.1415927, %v1192_v8 }
  0x29   : > { %v360_v27 = vadd.f32 3.1415927, %v1193_v9  ;;  %v361_v28 = vadd.f32 3.1415927, %v1194_v10  ;;  %v1771_v29 = vadd.f32 3.1415927, %v1195_v11 }
  0x2a   : > { %v1773_v30 = vadd.f32 3.1415927, %v1196_v12  ;;  %v1775_v31 = vadd.f32 3.1415927, %v1197_v13  ;;  %v1777_v32 = vadd.f32 3.1415927, %v1198_v14 }
  0x2b   : > { %v1779_v33 = vadd.f32 3.1415927, %v1199_v15  ;;  %v1781_v34 = vadd.f32 3.1415927, %v1200_v16  ;;  %v1783_v35 = vadd.f32 3.1415927, %v1201_v17 }
  0x2c   : > { %v1785_v36 = vadd.f32 3.1415927, %v1202_v18  ;;  %v1787_v37 = vadd.f32 3.1415927, %v1203_v19  ;;  %v1789_v38 = vadd.f32 3.1415927, %v1204_v20 }
  0x2d   : > { %vm372_vm1 = vcmp.ge.f32.partialorder %v354_v21, 6.2831855  ;;  %vm373_vm2 = vcmp.ge.f32.partialorder %v355_v22, 6.2831855  ;;  %vm374_vm3 = vcmp.ge.f32.partialorder %v356_v23, 6.2831855 }
  0x2e   : > { %vm375_vm4 = vcmp.ge.f32.partialorder %v357_v24, 6.2831855  ;;  %vm376_vm5 = vcmp.ge.f32.partialorder %v358_v25, 6.2831855  ;;  %vm377_vm6 = vcmp.ge.f32.partialorder %v359_v26, 6.2831855 }
  0x2f   : > { %v1205_v39 = vadd.f32 -6.2831855, %v354_v21  ;;  %v1206_v40 = vadd.f32 -6.2831855, %v355_v22  ;;  %v1207_v41 = vadd.f32 -6.2831855, %v356_v23 }
  0x30   : > { %v1208_v42 = vadd.f32 -6.2831855, %v357_v24  ;;  %vm378_vm7 = vcmp.ge.f32.partialorder %v360_v27, 6.2831855  ;;  %vm379_vm8 = vcmp.ge.f32.partialorder %v361_v28, 6.2831855 }
  0x31   : > { %vm380_vm9 = vcmp.ge.f32.partialorder %v1771_v29, 6.2831855  ;;  %vm381_vm10 = vcmp.ge.f32.partialorder %v1773_v30, 6.2831855  ;;  %vm382_vm11 = vcmp.ge.f32.partialorder %v1775_v31, 6.2831855  ;;  %v408_v45 = vsel %vm372_vm1, %v1205_v39, %v354_v21 }
  0x32   : > { %v1209_v43 = vadd.f32 -6.2831855, %v358_v25  ;;  %vm383_vm12 = vcmp.ge.f32.partialorder %v1777_v32, 6.2831855  ;;  %vm384_vm13 = vcmp.ge.f32.partialorder %v1779_v33, 6.2831855  ;;  %v409_v46 = vsel %vm373_vm2, %v1206_v40, %v355_v22 }
  0x33   : > { %v1210_v44 = vadd.f32 -6.2831855, %v359_v26  ;;  %vm385_vm14 = vcmp.ge.f32.partialorder %v1781_v34, 6.2831855  ;;  %v410_v47 = vsel %vm374_vm3, %v1207_v41, %v356_v23  ;;  %v411_v48 = vsel %vm375_vm4, %v1208_v42, %v357_v24 }
  0x34   : > { %vm386_vm15 = vcmp.ge.f32.partialorder %v1783_v35, 6.2831855  ;;  %v1211_v49 = vadd.f32 -6.2831855, %v360_v27  ;;  %v1212_v50 = vadd.f32 -6.2831855, %v361_v28  ;;  %v412_v53 = vsel %vm376_vm5, %v1209_v43, %v358_v25 }
  0x35   : > { %vm387_vm0 = vcmp.ge.f32.partialorder %v1785_v36, 6.2831855  ;;  %v1213_v51 = vadd.f32 -6.2831855, %v1771_v29  ;;  %v1214_v52 = vadd.f32 -6.2831855, %v1773_v30  ;;  %v413_v55 = vsel %vm377_vm6, %v1210_v44, %v359_v26 }
  0x36   : > { %v1223_v54 = vadd.f32 -3.1415927, %v408_v45  ;;  %vm388_vm1 = vcmp.ge.f32.partialorder %v1787_v37, 6.2831855  ;;  %v1224_v56 = vadd.f32 -3.1415927, %v409_v46  ;;  %v414_v3 = vsel %vm378_vm7, %v1211_v49, %v360_v27 }
  0x37   : > { %v1225_v57 = vadd.f32 -3.1415927, %v410_v47  ;;  %v1226_v58 = vadd.f32 -3.1415927, %v411_v48  ;;  %vm389_vm2 = vcmp.ge.f32.partialorder %v1789_v38, 6.2831855  ;;  %v415_v6 = vsel %vm379_vm8, %v1212_v50, %v361_v28 }
  0x38   : > { %v1215_v59 = vadd.f32 -6.2831855, %v1775_v31  ;;  %v1216_v60 = vadd.f32 -6.2831855, %v1777_v32  ;;  %v1217_v61 = vadd.f32 -6.2831855, %v1779_v33  ;;  %v416_v12 = vsel %vm380_vm9, %v1213_v51, %v1771_v29 }
  0x39   : > { %v1218_v62 = vadd.f32 -6.2831855, %v1781_v34  ;;  %v1219_v63 = vadd.f32 -6.2831855, %v1783_v35  ;;  %v1227_v0 = vadd.f32 -3.1415927, %v412_v53  ;;  %v417_v13 = vsel %vm381_vm10, %v1214_v52, %v1773_v30 }
  0x3a   : > { %v1220_v2 = vadd.f32 -6.2831855, %v1785_v36  ;;  %v1228_v4 = vadd.f32 -3.1415927, %v413_v55  ;;  %v444_v5 = vand.u32 2147483647, %v1223_v54  ;;  %v418_v14 = vsel %vm382_vm11, %v1215_v59, %v1775_v31 }
  0x3b   : > { %v445_v7 = vand.u32 2147483647, %v1224_v56  ;;  %v446_v8 = vand.u32 2147483647, %v1225_v57  ;;  %v447_v9 = vand.u32 2147483647, %v1226_v58  ;;  %v419_v15 = vsel %vm383_vm12, %v1216_v60, %v1777_v32 }
  0x3c   : > { %v1221_v10 = vadd.f32 -6.2831855, %v1787_v37  ;;  %v1222_v11 = vadd.f32 -6.2831855, %v1789_v38  ;;  %v1229_v16 = vadd.f32 -3.1415927, %v414_v3  ;;  %v420_v18 = vsel %vm384_vm13, %v1217_v61, %v1779_v33 }
  0x3d   : > { %v448_v17 = vand.u32 2147483647, %v1227_v0  ;;  %v1230_v19 = vadd.f32 -3.1415927, %v415_v6  ;;  %v449_v20 = vand.u32 2147483647, %v1228_v4  ;;  %v421_v22 = vsel %vm385_vm14, %v1218_v62, %v1781_v34 }
  0x3e   : > { %v462_v21 = vmul.f32 -10.0, %v444_v5  ;;  %v463_v23 = vmul.f32 -10.0, %v445_v7  ;;  %v464_v24 = vmul.f32 -10.0, %v446_v8  ;;  %v465_v25 = vmul.f32 -10.0, %v447_v9 }
  0x3f   : > { %v422_v26 = vsel %vm386_vm15, %v1219_v63, %v1783_v35  ;;  %v1231_v27 = vadd.f32 -3.1415927, %v416_v12  ;;  %v1232_v28 = vadd.f32 -3.1415927, %v417_v13  ;;  %v1233_v29 = vadd.f32 -3.1415927, %v418_v14 }
  0x40   : > { %v423_v30 = vsel %vm387_vm0, %v1220_v2, %v1785_v36  ;;  %v1234_v31 = vadd.f32 -3.1415927, %v419_v15  ;;  %v450_v32 = vand.u32 2147483647, %v1229_v16  ;;  %v466_v33 = vmul.f32 -10.0, %v448_v17 }
  0x41   : > { %v424_v34 = vsel %vm388_vm1, %v1221_v10, %v1787_v37  ;;  %v451_v39 = vand.u32 2147483647, %v1230_v19  ;;  %v467_v40 = vmul.f32 -10.0, %v449_v20  ;;  %v480_v41 = vmul.f32 1.442695, %v462_v21 }
  0x42   : > { %v425_v35 = vsel %vm389_vm2, %v1222_v11, %v1789_v38  ;;  %v482_v42 = vmul.f32 1.442695, %v463_v23  ;;  %v484_v43 = vmul.f32 1.442695, %v464_v24  ;;  %v486_v44 = vmul.f32 1.442695, %v465_v25 }
  0x43   : > { %v1235_v45 = vadd.f32 -3.1415927, %v420_v18  ;;  %v1236_v46 = vadd.f32 -3.1415927, %v421_v22  ;;  %v452_v36 = vand.u32 2147483647, %v1231_v27  ;;  %1515 = vpow2.f32 %v480_v41 }
  0x44   : > { %v1849_v47 = vadd.f32 -3.1415927, %v422_v26  ;;  %v468_v48 = vmul.f32 -10.0, %v450_v32  ;;  %1517 = vpow2.f32 %v482_v42  ;;  %v488_v49 = vmul.f32 1.442695, %v466_v33 }
  0x45   : > { %v1851_v37 = vadd.f32 -3.1415927, %v423_v30  ;;  %v1853_v50 = vadd.f32 -3.1415927, %v424_v34  ;;  %v453_v51 = vand.u32 2147483647, %v1232_v28  ;;  %1519 = vpow2.f32 %v484_v43 }
  0x46   : > { %v1855_v52 = vadd.f32 -3.1415927, %v425_v35  ;;  %v469_v38 = vmul.f32 -10.0, %v451_v39  ;;  %1521 = vpow2.f32 %v486_v44  ;;  %v490_v53 = vmul.f32 1.442695, %v467_v40 }
  0x47   : > { %v454_v54 = vand.u32 2147483647, %v1233_v29  ;;  %v455_v55 = vand.u32 2147483647, %v1234_v31  ;;  %v470_v56 = vmul.f32 -10.0, %v452_v36  ;;  %1523 = vpow2.f32 %v488_v49 }
  0x48   : > { %v456_v57 = vand.u32 2147483647, %v1235_v45  ;;  %v492_v58 = vmul.f32 1.442695, %v468_v48  ;;  %v1663_v59 = vmov 0.0   ;;  %v637_v60 = vlaneseq }
  0x49   : > { %618 = vmatprep.mubr.f32.mxu0 %v1663_v59  ;;  %259 = vst [vmem:[#allocation2] sm:$0x1f] %v1663_v59  ;;  %v457_v61 = vand.u32 2147483647, %v1236_v46  ;;  %v458_v62 = vand.u32 2147483647, %v1849_v47  ;;  %1525 = vpow2.f32 %v490_v53 }
  0x4a   : > { %v471_v63 = vmul.f32 -10.0, %v453_v51  ;;  %v494_v0 = vmul.f32 1.442695, %v469_v38  ;;  %v1860_v2 = vshrl.u32 %v637_v60, 7  ;;  %v1862_v3 = vand.u32 127, %v637_v60 }
  0x4b   : > { %v459_v4 = vand.u32 2147483647, %v1851_v37  ;;  %v472_v5 = vmul.f32 -10.0, %v454_v54  ;;  %v473_v6 = vmul.f32 -10.0, %v455_v55  ;;  %v496_v7 = vmul.f32 1.442695, %v470_v56 }
  0x4c   : > { %1527 = vpow2.f32 %v492_v58  ;;  %v651_v8 = vadd.s32 8, %v1860_v2  ;;  %v670_v9 = vand.u32 7, %v1860_v2  ;;  %v652_v10 = vadd.s32 16, %v1860_v2 }
  0x4d   : > { %v1868_v11 = vpop.eup %1515  ;;  %v474_v12 = vmul.f32 -10.0, %v456_v57  ;;  %v475_v13 = vmul.f32 -10.0, %v457_v61  ;;  %v498_v14 = vmul.f32 1.442695, %v471_v63  ;;  %v653_v15 = vadd.s32 24, %v1860_v2 }
  0x4e   : > { %v1871_v16 = vpop.eup %1517  ;;  %1529 = vpow2.f32 %v494_v0  ;;  %v671_v17 = vand.u32 7, %v651_v8  ;;  %vm1874_vm3 = vcmp.eq.s32.totalorder %v670_v9, %v1862_v3  ;;  %v672_v19 = vand.u32 7, %v652_v10 }
  0x4f   : > { %v1878_v20 = vpop.eup %1519  ;;  %v516_v21 = vadd.f32 %v1871_v16, %v1868_v11  ;;  %v1885_v22 = vsel %vm1874_vm3, 1.0, %v1663_v59  ;;  %v673_v23 = vand.u32 7, %v653_v15  ;;  %1531 = vpow2.f32 %v496_v7 }
  0x50   : > { %v1887_v24 = vpop.eup %1521  ;;  %v500_v25 = vmul.f32 1.442695, %v472_v5  ;;  %vm1890_vm4 = vcmp.eq.s32.totalorder %v671_v17, %v1862_v3  ;;  %vm1895_vm5 = vcmp.eq.s32.totalorder %v672_v19, %v1862_v3  ;;  %v502_v28 = vmul.f32 1.442695, %v473_v6 }
  0x51   : > { %v517_v29 = vadd.f32 %v1878_v20, %v516_v21  ;;  %v1903_v30 = vsel %vm1890_vm4, 1.0, %v1663_v59  ;;  %vm1351_vm6 = vmpackc.low %vm1890_vm4, %vm1874_vm3  ;;  %vm1910_vm7 = vcmp.eq.s32.totalorder %v673_v23, %v1862_v3  ;;  %v1914_v32 = vpop.eup %1523  ;;  %1533 = vpow2.f32 %v498_v14 }
  0x52   : > { %v1664_v33 = vmov 1.0|1.0   ;;  %v1378_v34 = vpack.c.bf16 %v1903_v30, %v1885_v22  ;;  %v1927_v39 = vsel %vm1895_vm5, 1.0, %v1663_v59  ;;  %v1932_v40 = vsel %vm1910_vm7, 1.0, %v1663_v59  ;;  %vm1354_vm8 = vmpackc.low %vm1910_vm7, %vm1895_vm5 }
  0x53   : > { %1352 = vmatpush1.bf16.msk.msra.mxu1 %vm1351_vm6, %v1664_v33  ;;  %v518_v41 = vadd.f32 %v1887_v24, %v517_v29  ;;  %v1382_v35 = vpack.c.bf16 %v1932_v40, %v1927_v39  ;;  %v1942_v42 = vpop.eup %1525  ;;  %v460_v43 = vand.u32 2147483647, %v1853_v50  ;;  %v476_v44 = vmul.f32 -10.0, %v458_v62 }
  0x54   : > { %1353 = vmatprep.subr.bf16.mxu1 %v1662_v1  ;;  %1535 = vpow2.f32 %v500_v25  ;;  %v504_v45 = vmul.f32 1.442695, %v474_v12  ;;  %v461_v47 = vand.u32 2147483647, %v1855_v52  ;;  %v477_v48 = vmul.f32 -10.0, %v459_v4 }
  0x55   : > { %v519_v46 = vadd.f32 %v1914_v32, %v518_v41  ;;  %1537 = vpow2.f32 %v502_v28  ;;  %v506_v49 = vmul.f32 1.442695, %v475_v13  ;;  %v478_v51 = vmul.f32 -10.0, %v460_v43 }
  0x56   : > { %v1528_v36 = vpop.eup %1527  ;;  %1539 = vpow2.f32 %v504_v45  ;;  %v508_v38 = vmul.f32 1.442695, %v476_v44  ;;  %v479_v54 = vmul.f32 -10.0, %v461_v47  ;;  %v510_v55 = vmul.f32 1.442695, %v477_v48 }
  0x57   : > { %1355 = vmatpush1.bf16.msk.msra.mxu1 %vm1354_vm8, %v1664_v33  ;;  %v520_v37 = vadd.f32 %v1942_v42, %v519_v46  ;;  %1541 = vpow2.f32 %v506_v49  ;;  %v512_v58 = vmul.f32 1.442695, %v478_v51  ;;  %vm260_vm9 = vcmask 126976  }
  0x58   : > { %1356 = vmatprep.subr.bf16.mxu1 %v1662_v1  ;;  %v1530_v50 = vpop.eup %1529  ;;  %1543 = vpow2.f32 %v508_v38  ;;  %v514_v62 = vmul.f32 1.442695, %v479_v54  ;;  %261 = vst.msk [vmem:[#allocation2 + $0x8] sm:$0x1f] %vm260_vm9, %v1663_v59  ;;  %v654_v26 = vadd.s32 32, %v1860_v2  ;;  %v655_v18 = vadd.s32 40, %v1860_v2 }
  0x59   : > { %v521_v53 = vadd.f32 %v1528_v36, %v520_v37  ;;  %v1532_v52 = vpop.eup %1531  ;;  %1545 = vpow2.f32 %v510_v55  ;;  %v656_v27 = vadd.s32 48, %v1860_v2  ;;  %v657_v31 = vadd.s32 56, %v1860_v2 }
  0x5a   : > { %1547 = vpow2.f32 %v512_v58 }
  0x5b   : > { %v522_v56 = vadd.f32 %v1530_v50, %v521_v53  ;;  %v1534_v57 = vpop.eup %1533  ;;  %1549 = vpow2.f32 %v514_v62  ;;  %v677_v62 = vand.u32 7, %v657_v31 }
  0x5d   : > { %v523_v60 = vadd.f32 %v1532_v52, %v522_v56  ;;  %vm695_vm14 = vcmp.eq.s32.totalorder %v677_v62, %v1862_v3 }
  0x5e   : > { %v1536_v61 = vpop.eup %1535 }
  0x5f   : > { %v524_v63 = vadd.f32 %v1534_v57, %v523_v60  ;;  %v1538_v0 = vpop.eup %1537  ;;  %v675_v60 = vand.u32 7, %v655_v18 }
  0x60   : > { %v1540_v5 = vpop.eup %1539 }
  0x61   : > { %v525_v4 = vadd.f32 %v1536_v61, %v524_v63  ;;  %v1542_v7 = vpop.eup %1541  ;;  %vm693_vm11 = vcmp.eq.s32.totalorder %v675_v60, %v1862_v3 }
  0x62   : > { %v1544_v9 = vpop.eup %1543 }
  0x63   : > { %v526_v6 = vadd.f32 %v1538_v0, %v525_v4  ;;  %v1546_v12 = vpop.eup %1545  ;;  %v658_v4 = vadd.s32 64, %v1860_v2 }
  0x64   : > { %v1548_v14 = vpop.eup %1547 }
  0x65   : > { %v527_v8 = vadd.f32 %v1540_v5, %v526_v6  ;;  %v1550_v17 = vpop.eup %1549 }
  0x67   : > { %v528_v10 = vadd.f32 %v1542_v7, %v527_v8 }
  0x69   : > { %v529_v13 = vadd.f32 %v1544_v9, %v528_v10  ;;  %v678_v10 = vand.u32 7, %v658_v4 }
  0x6b   : > { %v530_v15 = vadd.f32 %v1546_v12, %v529_v13  ;;  %vm2024_vm0 = vcmp.eq.s32.totalorder %v678_v10, %v1862_v3  ;;  %v639_v10 = vsub.s32 4, %v1860_v2 }
  0x6d   : > { %v531_v19 = vadd.f32 %v1548_v14, %v530_v15 }
  0x6f   : > { %v532_v21 = vadd.f32 %v1550_v17, %v531_v19 }
  0x71   : > { %1551 = vrcp.f32 %v532_v21 }
  0x7b   : > { %v1552_v23 = vpop.eup %1551 }
  0x7c   : > { %v534_v25 = vmul.f32 %v1552_v23, %v1868_v11  ;;  %v535_v28 = vmul.f32 %v1552_v23, %v1871_v16  ;;  %v540_v29 = vmul.f32 %v1552_v23, %v1528_v36  ;;  %v541_v41 = vmul.f32 %v1552_v23, %v1530_v50 }
  0x7d   : > { %v536_v44 = vmul.f32 %v1552_v23, %v1878_v20  ;;  %v542_v45 = vmul.f32 %v1552_v23, %v1532_v52  ;;  %v543_v46 = vmul.f32 %v1552_v23, %v1534_v57  ;;  %v537_v47 = vmul.f32 %v1552_v23, %v1887_v24 }
  0x7e   : > { %v1324_v43 = vpack.c.bf16 %v535_v28, %v534_v25  ;;  %v1333_v48 = vpack.c.bf16 %v541_v41, %v540_v29  ;;  %v544_v49 = vmul.f32 %v1552_v23, %v1536_v61  ;;  %v545_v37 = vmul.f32 %v1552_v23, %v1538_v0 }
  0x7f   : > { %v1336_v51 = vpack.c.bf16 %v543_v46, %v542_v45  ;;  %v546_v38 = vmul.f32 %v1552_v23, %v1540_v5  ;;  %v547_v53 = vmul.f32 %v1552_v23, %v1542_v7  ;;  %v548_v54 = vmul.f32 %v1552_v23, %v1544_v9 }
  0x80   : > { %1325 = vmatpush1.bf16.xpose.msra.mxu0 %v1324_v43  ;;  %v1339_v11 = vpack.c.bf16 %v545_v37, %v544_v49  ;;  %v549_v16 = vmul.f32 %v1552_v23, %v1546_v12  ;;  %v550_v36 = vmul.f32 %v1552_v23, %v1548_v14  ;;  %v551_v50 = vmul.f32 %v1552_v23, %v1550_v17 }
  0x81   : > { %1326 = vmatprep.subr.bf16.mxu0 %v1662_v1  ;;  %v1342_v55 = vpack.c.bf16 %v547_v53, %v546_v38  ;;  %v1327_v56 = vpack.c.bf16 %v537_v47, %v536_v44  ;;  %v538_v24 = vmul.f32 %v1552_v23, %v1914_v32  ;;  %v539_v57 = vmul.f32 %v1552_v23, %v1942_v42  ;;  %v335_v32 = vld [vmem:[%s1764_s18] sm:$0x1f] }
  0x82   : > { %v1345_v20 = vpack.c.bf16 %v549_v16, %v548_v54  ;;  %v1348_v52 = vpack.c.bf16 %v551_v50, %v550_v36  ;;  %v674_v42 = vand.u32 7, %v654_v26  ;;  %v676_v61 = vand.u32 7, %v656_v27 }
  0x83   : > { %v1330_v58 = vpack.c.bf16 %v539_v57, %v538_v24  ;;  %v1999_v0 = vsel %vm693_vm11, 1.0, %v1663_v59  ;;  %v659_v5 = vadd.s32 72, %v1860_v2  ;;  %v660_v7 = vadd.s32 80, %v1860_v2 }
  0x84   : > { %vm692_vm10 = vcmp.eq.s32.totalorder %v674_v42, %v1862_v3  ;;  %vm694_vm13 = vcmp.eq.s32.totalorder %v676_v61, %v1862_v3  ;;  %v2014_v9 = vsel %vm695_vm14, 1.0, %v1663_v59  ;;  %v661_v14 = vadd.s32 88, %v1860_v2  ;;  %v553_v61 = vld [vmem:[#allocation2 + $0x8] sm:$0x1f] }
  0x85   : > { %vm1357_vm12 = vmpackc.low %vm693_vm11, %vm692_vm10  ;;  %v1996_v63 = vsel %vm692_vm10, 1.0, %v1663_v59  ;;  %v2011_v8 = vsel %vm694_vm13, 1.0, %v1663_v59  ;;  %v679_v12 = vand.u32 7, %v659_v5  ;;  %v680_v15 = vand.u32 7, %v660_v7 }
  0x86   : > { %1358 = vmatpush1.bf16.msk.msra.mxu1 %vm1357_vm12, %v1664_v33  ;;  %v1386_v6 = vpack.c.bf16 %v1999_v0, %v1996_v63  ;;  %vm1360_vm15 = vmpackc.low %vm695_vm14, %vm694_vm13  ;;  %v1390_v13 = vpack.c.bf16 %v2014_v9, %v2011_v8  ;;  %v662_v17 = vadd.s32 96, %v1860_v2  ;;  %v663_v23 = vadd.s32 104, %v1860_v2 }
  0x87   : > { %1359 = vmatprep.subr.bf16.mxu1 %v1662_v1  ;;  %vm2029_vm1 = vcmp.eq.s32.totalorder %v679_v12, %v1862_v3  ;;  %v664_v25 = vadd.s32 112, %v1860_v2  ;;  %v2039_v28 = vsel %vm2024_vm0, 1.0, %v1663_v59  ;;  %v681_v41 = vand.u32 7, %v661_v14 }
  0x88   : > { %1328 = vmatpush1.bf16.xpose.msra.mxu0 %v1327_v56  ;;  %v2044_v29 = vsel %vm2029_vm1, 1.0, %v1663_v59  ;;  %vm1363_vm2 = vmpackc.low %vm2029_vm1, %vm2024_vm0  ;;  %vm2051_vm3 = vcmp.eq.s32.totalorder %v680_v15, %v1862_v3  ;;  %v682_v46 = vand.u32 7, %v662_v17  ;;  %v683_v47 = vand.u32 7, %v663_v23 }
  0x89   : > { %1329 = vmatprep.subr.bf16.mxu0 %v1662_v1  ;;  %v1394_v44 = vpack.c.bf16 %v2044_v29, %v2039_v28  ;;  %v2060_v45 = vsel %vm2051_vm3, 1.0, %v1663_v59  ;;  %vm2064_vm4 = vcmp.eq.s32.totalorder %v681_v41, %v1862_v3  ;;  %v665_v49 = vadd.s32 120, %v1860_v2 }
  0x8a   : > { %1361 = vmatpush1.bf16.msk.msra.mxu1 %vm1360_vm15, %v1664_v33  ;;  %v684_v37 = vand.u32 7, %v664_v25  ;;  %v2075_v38 = vsel %vm2064_vm4, 1.0, %v1663_v59  ;;  %vm1366_vm5 = vmpackc.low %vm2064_vm4, %vm2051_vm3  ;;  %vm2087_vm7 = vcmp.eq.s32.totalorder %v683_v47, %v1862_v3  ;;  %vm816_vm0 = vcmask 64512  }
  0x8b   : > { %1362 = vmatprep.subr.bf16.mxu1 %v1662_v1  ;;  %v1398_v16 = vpack.c.bf16 %v2075_v38, %v2060_v45  ;;  %v2103_v50 = vsel %vm2087_vm7, 1.0, %v1663_v59  ;;  %vm742_vm1 = vcmask 130048  }
  0x8e   : > { %1364 = vmatpush1.bf16.msk.msra.mxu1 %vm1363_vm2, %v1664_v33 }
  0x8f   : > { %1365 = vmatprep.subr.bf16.mxu1 %v1662_v1 }
  0x90   : > { %1331 = vmatpush1.bf16.xpose.msra.mxu0 %v1330_v58 }
  0x91   : > { %1332 = vmatprep.subr.bf16.mxu0 %v1662_v1 }
  0x92   : > { %1367 = vmatpush1.bf16.msk.msra.mxu1 %vm1366_vm5, %v1664_v33 }
  0x93   : > { %1368 = vmatprep.subr.bf16.mxu1 %v1662_v1 }
  0x98   : > { %1334 = vmatpush1.bf16.xpose.msra.mxu0 %v1333_v48  ;;  %v1034_v48 = vld [vmem:[%s1766_s23] sm:$0xf] }
  0x99   : > { %1335 = vmatprep.subr.bf16.mxu0 %v1662_v1 }
  0xa0   : > { %1337 = vmatpush1.bf16.xpose.msra.mxu0 %v1336_v51  ;;  %v666_v51 = vadd.s32 128, %v1860_v2 }
  0xa1   : > { %1338 = vmatprep.subr.bf16.mxu0 %v1662_v1 }
  0xa2   : > { %v686_v56 = vand.u32 7, %v666_v51 }
  0xa8   : > { %1340 = vmatpush1.bf16.xpose.msra.mxu0 %v1339_v11  ;;  %v667_v11 = vadd.s32 136, %v1860_v2 }
  0xa9   : > { %1341 = vmatprep.subr.bf16.mxu0 %v1662_v1 }
  0xaa   : > { %v687_v24 = vand.u32 7, %v667_v11 }
  0xac   : > { %vm2150_vm13 = vcmp.eq.s32.totalorder %v687_v24, %v1862_v3 }
  0xad   : > { %v1258_v27 = vsel %vm2150_vm13, 1.0, %v1663_v59 }
  0xb0   : > { %1343 = vmatpush1.bf16.xpose.msra.mxu0 %v1342_v55  ;;  %v685_v55 = vand.u32 7, %v665_v49 }
  0xb1   : > { %1344 = vmatprep.subr.bf16.mxu0 %v1662_v1 }
  0xb2   : > { %vm2119_vm10 = vcmp.eq.s32.totalorder %v685_v55, %v1862_v3 }
  0xb8   : > { %1346 = vmatpush1.bf16.xpose.msra.mxu0 %v1345_v20 }
  0xb9   : > { %1347 = vmatprep.subr.bf16.mxu0 %v1662_v1 }
  0xc0   : > { %1349 = vmatpush1.bf16.xpose.msra.mxu0 %v1348_v52 }
  0xc1   : > { %1413 = vmatprep.subr.bf16.mxu0 %v1662_v1 }
  0xc7   : > { %619 = vmatmul.mubr.f32.vlgmr.msra.gmra.mrb[0].mxu0 %v335_v32  ;;  %v2142_v32 = vsel %vm2119_vm10, 1.0, %v1663_v59 }
  0xc8   : > { %1415 = vmatpush1.bf16.msk.msra.mxu0 %vm1351_vm6, %v1664_v33  ;;  %vm2082_vm6 = vcmp.eq.s32.totalorder %v682_v46, %v1862_v3 }
  0xc9   : > { %1416 = vmatprep.subr.bf16.mxu0 %v1662_v1  ;;  %v2098_v36 = vsel %vm2082_vm6, 1.0, %v1663_v59  ;;  %vm1369_vm11 = vmpackc.low %vm2087_vm7, %vm2082_vm6 }
  0xca   : > { %v1402_v20 = vpack.c.bf16 %v2103_v50, %v2098_v36  ;;  %1370 = vmatpush1.bf16.msk.msra.mxu1 %vm1369_vm11, %v1664_v33 }
  0xcb   : > { %1371 = vmatprep.subr.bf16.mxu1 %v1662_v1 }
  0xcc   : > { %1418 = vmatpush1.bf16.msk.msra.mxu0 %vm1354_vm8, %v1664_v33  ;;  %vm2108_vm8 = vcmp.eq.s32.totalorder %v684_v37, %v1862_v3 }
  0xcd   : > { %1419 = vmatprep.subr.bf16.mxu0 %v1662_v1  ;;  %v2126_v58 = vsel %vm2108_vm8, 1.0, %v1663_v59  ;;  %vm1372_vm14 = vmpackc.low %vm2119_vm10, %vm2108_vm8 }
  0xce   : > { %v1406_v42 = vpack.c.bf16 %v2142_v32, %v2126_v58  ;;  %1373 = vmatpush1.bf16.msk.msra.mxu1 %vm1372_vm14, %v1664_v33 }
  0xcf   : > { %1374 = vmatprep.subr.bf16.mxu1 %v1662_v1 }
  0xd0   : > { %1421 = vmatpush1.bf16.msk.msra.mxu0 %vm1357_vm12, %v1664_v33  ;;  %vm2145_vm12 = vcmp.eq.s32.totalorder %v686_v56, %v1862_v3  ;;  %v552_v3 = vld [vmem:[#allocation2] sm:$0x1f] }
  0xd1   : > { %1422 = vmatprep.subr.bf16.mxu0 %v1662_v1  ;;  %v1257_v60 = vsel %vm2145_vm12, 1.0, %v1663_v59 }
  0xd2   : > { %v1410_v31 = vpack.c.bf16 %v1258_v27, %v1257_v60 }
  0xd4   : > { %1424 = vmatpush1.bf16.msk.msra.mxu0 %vm1360_vm15, %v1664_v33  ;;  %vm1375_vm15 = vmpackc.low %vm2150_vm13, %vm2145_vm12 }
  0xd5   : > { %1425 = vmatprep.subr.bf16.mxu0 %v1662_v1  ;;  %1376 = vmatpush1.bf16.msk.msra.mxu1 %vm1375_vm15, %v1664_v33 }
  0xd6   : > { %1377 = vmatprep.subr.bf16.mxu1 %v1662_v1 }
  0xd8   : > { %1427 = vmatpush1.bf16.msk.msra.mxu0 %vm1363_vm2, %v1664_v33  ;;  %vm2186_vm2 = vmpackc.low %vm816_vm0, %vm816_vm0 }
  0xd9   : > { %1428 = vmatprep.subr.bf16.mxu0 %v1662_v1 }
  0xdc   : > { %1430 = vmatpush1.bf16.msk.msra.mxu0 %vm1366_vm5, %v1664_v33 }
  0xdd   : > { %1431 = vmatprep.subr.bf16.mxu0 %v1662_v1 }
  0xe0   : > { %1433 = vmatpush1.bf16.msk.msra.mxu0 %vm1369_vm11, %v1664_v33 }
  0xe1   : > { %1434 = vmatprep.subr.bf16.mxu0 %v1662_v1 }
  0xe4   : > { %1436 = vmatpush1.bf16.msk.msra.mxu0 %vm1372_vm14, %v1664_v33 }
  0xe5   : > { %1437 = vmatprep.subr.bf16.mxu0 %v1662_v1 }
  0xe8   : > { %1439 = vmatpush1.bf16.msk.msra.mxu0 %vm1375_vm15, %v1664_v33 }
 0x19a   : > { %v620_v62 = vpop.f32.mrb[0].mxu0 }
 0x19b   : > { %v625_v4 = vadd.f32 %v620_v62, %v552_v3  ;;  %v622_v5 = vpop.f32.mrb[1].mxu0 }
 0x19c   : > { %v626_v7 = vadd.f32 %v622_v5, %v553_v61 }
 0x19d   : > { %627 = vst [vmem:[#allocation2] sm:$0x1f] %v625_v4 }
 0x19e   : > { %629 = vst.msk [vmem:[#allocation2 + $0x8] sm:$0x1f] %vm260_vm9, %v626_v7  ;;  %vm1036_vm9 = vcmask 60416  }
 0x1a4   : > { %v633_v12 = vld [vmem:[#allocation2] sm:$0x1f] }
 0x1a5   : > { %v634_v14 = vld [vmem:[#allocation2 + $0x8] sm:$0x1f]  ;;  %v635_v15 = vadd.f32 1e-10, %v633_v12 }
 0x1a6   : > { %v636_v17 = vadd.f32 1e-10, %v634_v14 }
 0x1a7   : > { %v640_v19 = vrot.slane %v635_v15, %v639_v10 }
 0x1a8   : > { %v644_v21 = vrot.slane %v636_v17, %v639_v10 }
 0x1a9   : > { %1553 = vrcp.f32 %v640_v19 }
 0x1aa   : > { %1555 = vrcp.f32 %v644_v21 }
 0x1b3   : > { %v1554_v33 = vpop.eup %1553 }
 0x1b4   : > { %v1556_v23 = vpop.eup %1555  ;;  %v646_v41 = vmul.f32 %v1554_v33, %v633_v12 }
 0x1b5   : > { %v648_v25 = vmul.f32 %v1556_v23, %v634_v14 }
 0x1b7   : > { %1277 = vmatprep.mubr.msk.f32.mxu1 %vm742_vm1, %v648_v25 }
 0x1b8   : > { %811 = vmatmul.mubr.f32.vlgmr.msra.gmra.mrb[0].mxu1 %v646_v41 }
 0x1b9   : > { %1380 = vmatpush1.bf16.xpose.msk.msra.mxu1 %vm2186_vm2, %v1378_v34  ;;  %938 = vmatprep.mubr.f32.mxu1 %v1663_v59 }
 0x1ba   : > { %1381 = vmatprep.subr.bf16.mxu1 %v1662_v1 }
 0x1c1   : > { %1384 = vmatpush1.bf16.xpose.msk.msra.mxu1 %vm2186_vm2, %v1382_v35 }
 0x1c2   : > { %1385 = vmatprep.subr.bf16.mxu1 %v1662_v1 }
 0x1c9   : > { %1388 = vmatpush1.bf16.xpose.msk.msra.mxu1 %vm2186_vm2, %v1386_v6 }
 0x1ca   : > { %1389 = vmatprep.subr.bf16.mxu1 %v1662_v1 }
 0x1d1   : > { %1392 = vmatpush1.bf16.xpose.msk.msra.mxu1 %vm2186_vm2, %v1390_v13 }
 0x1d2   : > { %1393 = vmatprep.subr.bf16.mxu1 %v1662_v1 }
 0x1d9   : > { %1396 = vmatpush1.bf16.xpose.msk.msra.mxu1 %vm2186_vm2, %v1394_v44 }
 0x1da   : > { %1397 = vmatprep.subr.bf16.mxu1 %v1662_v1 }
 0x1e1   : > { %1400 = vmatpush1.bf16.xpose.msk.msra.mxu1 %vm2186_vm2, %v1398_v16 }
 0x1e2   : > { %1401 = vmatprep.subr.bf16.mxu1 %v1662_v1 }
 0x1e9   : > { %1404 = vmatpush1.bf16.xpose.msk.msra.mxu1 %vm2186_vm2, %v1402_v20 }
 0x1ea   : > { %1405 = vmatprep.subr.bf16.mxu1 %v1662_v1 }
 0x1f1   : > { %1408 = vmatpush1.bf16.xpose.msk.msra.mxu1 %vm2186_vm2, %v1406_v42 }
 0x1f2   : > { %1409 = vmatprep.subr.bf16.mxu1 %v1662_v1 }
 0x1f9   : > { %1412 = vmatpush1.bf16.xpose.msk.msra.mxu1 %vm2186_vm2, %v1410_v31 }
 0x28b   : > { %v812_v59 = vpop.f32.mrb[0].mxu1 }
 0x28c   : > { %v813_v2 = vadd.f32 1e-10, %v812_v59  ;;  %v814_v22 = vpop.f32.mrb[1].mxu1 }
 0x28e   : > { %1296 = vmatmul.mubr.msk.f32.vlgmr.msra.gmra.mrb[2].mxu1 %vm816_vm0, %v813_v2 }
 0x361   : > { %v940_v30 = vpop.f32.mrb[2].mxu1 }
 0x362   : > { %1557 = vrcp.f32 %v940_v30  ;;  %v942_v34 = vpop.f32.mrb[3].mxu1 }
 0x363   : > { %1559 = vrcp.f32 %v942_v34 }
 0x36c   : > { %v1558_v39 = vpop.eup %1557 }
 0x36d   : > { %v1560_v40 = vpop.eup %1559  ;;  %v946_v35 = vmul.f32 %v1558_v39, %v646_v41 }
 0x36e   : > { %v948_v63 = vmul.f32 %v1560_v40, %v648_v25 }
 0x36f   : > { %v949_v0 = vmax.f32 %v946_v35, 1e-10 }
 0x370   : > { %v950_v6 = vmax.f32 %v948_v63, 1e-10 }
 0x371   : > { %1561 = vlog2.f32 %v949_v0 }
 0x372   : > { %1563 = vlog2.f32 %v950_v6 }
 0x37b   : > { %v1562_v1 = vpop.eup %1561 }
 0x37c   : > { %v1564_v8 = vpop.eup %1563  ;;  %v952_v9 = vmul.f32 0.6931472, %v1562_v1 }
 0x37d   : > { %v954_v13 = vmul.f32 0.6931472, %v1564_v8 }
 0x37e   : > { %v955_v29 = vmul.f32 %v952_v9, %v949_v0 }
 0x37f   : > { %v956_v28 = vmul.f32 %v954_v13, %v950_v6 }
 0x381   : > { %1315 = vmatprep.mubr.msk.f32.mxu0 %vm742_vm1, %v956_v28 }
 0x382   : > { %1025 = vmatmul.mubr.f32.vlgmr.msra.gmra.mrb[2].mxu0 %v955_v29 }
 0x455   : > { %v1026_v44 = vpop.f32.mrb[2].mxu0 }
 0x456   : > { %v1030_v45 = vsub.f32 0.0, %v1026_v44  ;;  %v1028_v46 = vpop.f32.mrb[3].mxu0 }
 0x458   : > { %v1031_v47 = vsub.f32 2.8903718, %v1030_v45  ;;  %1042 = sbr.rel (!%p1038_p1) target bundleno = 1129 (0x469), region = 44 }
 0x45a   : > { %v1033_v49 = vmul.f32 0.34597626, %v1031_v47 }
 0x45c   : > { %v1035_v37 = vadd.f32 %v1034_v48, %v1033_v49 }
 0x45e   : > { %1037 = vst.msk [vmem:[%s1766_s23] sm:$0xf] %vm1036_vm9, %v1035_v37 }
 0x465   : > { %v1043_v51 = vld [vmem:[%s1766_s23] sm:$0xf] }
 0x466   : > { %v1045_v38 = vmul.f32 0.5, %v1043_v51 }
 0x468   : > { %1047 = vst.msk [vmem:[%s1766_s23] sm:$0xf] %vm1036_vm9, %v1045_v38 }
 0x469 PF: > { %s1318_s12 = sshll.u32 %s1647_s13, 6  ;;  %s1063_s29 = sshll.u32 %s1766_s23, 4  ;;  %s1064_s29 = int_to_ptr.vmem [resolvable:$true] %s1063_s29 }
 0x46a   : > { %s2250_s28 = scalar_lea.hbm %s2302_s2, %s1318_s12  ;;  %s1049_s30 = scalar_lea.sflag [#allocation4], %s219_s26 }
 0x46b   : > { %s1565_s3 = scalar_lea.vmem %s1064_s29, 64  ;;  %s1665_s4 = smov [#allocation3]  }
 0x46c   : > { %p1566_p2 = scmp.ne.s32.totalorder %s1064_s29, %s1565_s3  ;;  %s1569_s5 = sshll.u32 %s1665_s4, 4  ;;  %s1570_s5 = int_to_ptr.vmem [resolvable:$false] %s1569_s5 }
 0x46d   : > { %s1571_s6 = scalar_lea.vmem %s1570_s5, 128  ;;  %p1572_p6 = scmp.lt.s32.totalorder %s1064_s29, %s1570_s5 }
 0x46e   : > { %p1567_p4 = pnand %p1566_p2, %p1730_p3  ;;  %p1573_p7 = scmp.lt.s32.totalorder %s1571_s6, %s1565_s3 }
 0x470   : > { %p1568_p5 = pneg %p1567_p4  ;;  %p1574_p8 = por %p1573_p7, %p1572_p6 }
 0x472   : > { %p1575_p10 = pnand %p1574_p8, %p1568_p5 }
 0x474   : > { %1578 = shalt.err (!%p1575_p10)
}
 0x475   : > { %s1579_s13 = scalar_lea.hbm %s2250_s28, 64  ;;  %s1583_s8 = scalar_lea.hbm %s2302_s2, 256 }
 0x476   : > { %p1580_p11 = scmp.ne.s32.totalorder %s2250_s28, %s1579_s13  ;;  %p1584_p0 = scmp.lt.u32.totalorder %s2250_s28, %s2302_s2 }
 0x477   : > { %p1585_p1 = scmp.lt.u32.totalorder %s1583_s8, %s1579_s13  ;;  %p1587_p4 = scmp.lt.u32.totalorder %s1579_s13, %s2250_s28 }
 0x478   : > { %p1581_p12 = pnand %p1580_p11, %p1730_p3 }
 0x479   : > { %p1586_p2 = por %p1585_p1, %p1584_p0 }
 0x47a   : > { %p1582_p13 = pneg %p1581_p12 }
 0x47b   : > { %p1588_p5 = por %p1587_p4, %p1586_p2 }
 0x47d   : > { %p1589_p6 = pnand %p1588_p5, %p1582_p13 }
 0x47f   : > { %1592 = shalt.err (!%p1589_p6)
}
 0x480   : > { %1440 = dma.vmem_to_hbm [thread:$0]  (%p1730_p3), %s1064_s29, 64, %s2250_s28, %s1049_s30  }
 0x481 PF: > { %p1446_p7 = scmp.ge.s32.totalorder %s1659_s16, 2  ;;  %s1075_s23 = sand.u32 1, %s1631_s9  }
 0x482   : > { %s1076_s12 = scalar_lea.sflag [#allocation4], %s1075_s23 }
 0x483   : > { %p1443_p8 = pnand %p1446_p7, %p1740_p9 }
 0x485   : > { %1626 = dma.done.wait (!%p1443_p8), %s1076_s12, 64  }
 0x486   : > { %1628 = vsyncadd (!%p1443_p8), %s1076_s12, 4294967232  ;;  %s15_s16 = sadd.s32 1, %s1659_s16   ;;  %s2335_s9 = smov %s1635_s10 }
 0x487   : > { %p12_p10 = scmp.ge.s32.totalorder %s15_s16, 10   ;;  %s2336_s10 = smov %s1639_s11 }
 0x488   : > { %s2337_s11 = smov %s1748_s25  ;;  %s2338_s12 = smov %s1651_s14 }
 0x489   : > { %s2339_s13 = smov %s1655_s15  ;;  %s2340_s14 = smov %s2343_s19 }
 0x48a   : > { %s2341_s15 = smov %s2347_s20  ;;  %14 = sbr.rel (!%p12_p10) target bundleno = 5 (0x5), region = 82 }
 0x491   :  { %1081 = vsyncpa [#allocation4], 1 }
 0x492   :  { %1083 = vsyncpa [#allocation4 + $0x1], 1 }

</bundles_post_ra>
